<compile_context>
chip_gen: v7x
topology: tpu7x:2x2x1
jax: 0.10.0
libtpu: 0.0.40
codegen_flags: <defaults>
</compile_context>

<pallas_src>
import functools
import math

import numpy as np
import jax
import jax.numpy as jnp
from jax import lax
from jax.experimental import pallas as pl
from jax.experimental.pallas import tpu as pltpu

F32 = jnp.float32
BF16 = jnp.bfloat16

_TRANS_B = (((1,), (1,)), ((), ()))   # dot_general dims for A @ B^T

# tri-state cache: can we single-buffer grid-invariant operands on this install?
_SINGLE_BUFFER_WEIGHTS = [True]


def _round_up(x, m):
  return ((x + m - 1) // m) * m


@functools.lru_cache(maxsize=None)
def _vmem_limit_bytes():
  """Per-generation VMEM budget (leave ~1/3 of physical for scratch/spill/IO)."""
  cap = 128 * 1024 * 1024
  try:
    cap = int(pltpu.get_tpu_info().vmem_capacity_bytes)
  except Exception:
    pass
  return min(96 * 1024 * 1024, (cap * 2) // 3)


# ----------------------------- in-kernel math ------------------------------

def _erf(x):
  # Abramowitz & Stegun 7.1.26 rational approximation, |err| <= 1.5e-7.
  a1, a2, a3, a4, a5 = 0.254829592, -0.284496736, 1.421413741, -1.453152027, 1.061405429
  p = 0.3275911
  s = jnp.where(x >= 0.0, 1.0, -1.0)
  ax = jnp.abs(x)
  t = 1.0 / (1.0 + p * ax)
  poly = ((((a5 * t + a4) * t + a3) * t + a2) * t + a1) * t
  return s * (1.0 - poly * jnp.exp(-ax * ax))


def _gelu_exact(x):
  # F.gelu default (erf formulation).
  # TODO(synk): tanh-approx GELU would move work onto the EUP slot on v6e/v7x at
  # ~1e-3 deviation from torch exact GELU; keeping erf for semantic fidelity.
  return 0.5 * x * (1.0 + _erf(x * 0.7071067811865476))


def _layernorm(x, g, b, eps=1e-5):
  # eps=1e-5: PyTorch nn.LayerNorm default, as used by the reference module.
  mu = jnp.mean(x, axis=-1, keepdims=True)
  xc = x - mu
  var = jnp.mean(xc * xc, axis=-1, keepdims=True)
  return xc * lax.rsqrt(var + eps) * g + b


# ------------------------- relative-shift primitives -------------------------
# Convention: bd is scored against a positional matrix whose row c (c >= 1) holds
# projected pos row (c-1); row 0 is the torch rel_shift "zero pad column" and is
# never read.  The desired output is out[i, j] = bd[i, j + N - i].

def _rel_shift_roll(bd, n):
  """Strided lane-rotate: one XLU op, O(N * L) data movement."""
  l = bd.shape[-1]
  # row i is rolled right by (l - n + i)  ==>  rolled[i, j] = bd[i, j + n - i]
  rolled = pltpu.roll(bd, l - n, 1, stride=1, stride_axis=0)
  return rolled[:, :n]


def _rel_shift_logroll(bd, n):
  """Fallback: per-row rotate via binary decomposition of the shift amount.
  log2(L) plain XLU rolls + VPU selects; O(N*L*logL), always lowers, no big temps."""
  l = bd.shape[-1]
  row = lax.broadcasted_iota(jnp.int32, bd.shape, 0)
  shift = l - n + row                      # per-row right-rotate amount, < l
  out = bd
  step = 1
  while step < l:
    rolled = pltpu.roll(out, step, 1)
    out = jnp.where((shift & step) != 0, rolled, out)
    step *= 2
  return out[:, :n]


@functools.lru_cache(maxsize=None)
def _strided_roll_rel_shift_ok(n, l):
  """One-time probe: does the strided-roll rel_shift lower & match on this chip?"""
  def kern(x_ref, o_ref):
    o_ref[...] = _rel_shift_roll(x_ref[...], n)

  x_np = np.arange(n * l, dtype=np.float32).reshape(n, l)
  try:
    got = pl.pallas_call(
        kern, out_shape=jax.ShapeDtypeStruct((n, n), F32))(jnp.asarray(x_np))
    got = np.asarray(jax.block_until_ready(got))
  except Exception:
    return False
  want = np.stack([x_np[i, np.arange(n) + n - i] for i in range(n)])
  return bool(np.allclose(got, want))


# -------------------------------- kernels -----------------------------------

def _pos_proj_kernel(pos_ref, wp_ref, bp_ref, o_ref):
  """Layer-independent project_pos_emb (hoisted across layers); bf16 output."""
  o_ref[...] = (jnp.dot(pos_ref[...], wp_ref[...], preferred_element_type=F32)
                + bp_ref[...]).astype(o_ref.dtype)


def _linear_pos_kernel(p_ref, w_ref, o_ref):
  """Per-layer bias-free linear_pos; output stays lane-dense (Lp, hidden) bf16."""
  o_ref[...] = jnp.dot(p_ref[...], w_ref[...],
                       preferred_element_type=F32).astype(o_ref.dtype)


def _encoder_layer_kernel(
    x_ref, res_ref, p_ref, pbu_ref, pbv_ref,
    wfx_ref, wfr_ref, bf_ref,
    wqkv_ref, bqkv_ref,
    wo_ref, bo_ref, ln1g_ref, ln1b_ref,
    w1_ref, b1_ref, w2_ref, b2_ref, ln2g_ref, ln2b_ref,
    wac_ref, bac_ref,
    acou_ref, newres_ref,
    ctx_ref,
    *, n_head, d_k, use_roll):
  """One full BertEncoderCTC layer for one batch element (grid axis = batch)."""
  x = x_ref[0]        # (N, V)   bf16 CTC features
  res = res_ref[0]    # (N, Hd)  bf16 residual stream
  n = x.shape[0]
  hidden = n_head * d_k

  # fuse_inputs(cat([x, residual], -1)) == x @ Wf_x + res @ Wf_r + bf
  h = (jnp.dot(x, wfx_ref[...], preferred_element_type=F32)
       + jnp.dot(res, wfr_ref[...], preferred_element_type=F32)
       + bf_ref[...])
  h_bf = h.astype(BF16)

  # fused Q/K/V projection (one full-K lane-dense MXU matmul); 1/sqrt(d_k) is
  # already folded into the packed w_q/b_q and pos biases, so no score scaling.
  qkv = jnp.dot(h_bf, wqkv_ref[...], preferred_element_type=F32) + bqkv_ref[...]
  q = qkv[:, :hidden]
  k_bf = qkv[:, hidden:2 * hidden].astype(BF16)
  v_bf = qkv[:, 2 * hidden:].astype(BF16)
  q_u = (q + pbu_ref[...]).astype(BF16)          # pre-scaled pos_bias_u, all heads
  q_v = (q + pbv_ref[...]).astype(BF16)          # pre-scaled pos_bias_v, all heads
  p_bf = p_ref[...]                              # (Lp, hidden) bf16 positional proj

  # Static unroll over heads (n_head small); lean body: scores / softmax / attn@V.
  # TODO(synk): for large head counts use lax.fori_loop + pl.ds slices to bound
  # vreg live ranges (verify no spill in the bundle dump for the unrolled form).
  for hd in range(n_head):
    sl = slice(hd * d_k, (hd + 1) * d_k)
    ac = lax.dot_general(q_u[:, sl], k_bf[:, sl], _TRANS_B,
                         preferred_element_type=F32)          # (N, N)
    bd = lax.dot_general(q_v[:, sl], p_bf[:, sl], _TRANS_B,
                         preferred_element_type=F32)          # (N, Lp)
    bd_shift = (_rel_shift_roll(bd, n) if use_roll
                else _rel_shift_logroll(bd, n))               # (N, N)
    scores = ac + bd_shift                     # already scaled by 1/sqrt(d_k)
    # TODO(synk): boolean attention_mask branch (masked_fill -10000.0 and the
    # post-softmax zero-fill) is not wired through; wrapper enforces mask=None.
    m = jnp.max(scores, axis=-1, keepdims=True)
    e = jnp.exp(scores - m)
    s = jnp.sum(e, axis=-1, keepdims=True)
    r = pl.reciprocal(s, approx=True)
    r = r * (2.0 - s * r)                 # one Newton step: ~f32-accurate, EUP path
    attn = e * r
    # bf16 ctx scratch: halves scratch bytes + store traffic.
    ctx_ref[:, sl] = jnp.dot(attn.astype(BF16), v_bf[:, sl],
                             preferred_element_type=F32).astype(BF16)

  # linear_out over all heads at once: full-K, lane-dense matmul
  attn_out = jnp.dot(ctx_ref[...], wo_ref[...],
                     preferred_element_type=F32) + bo_ref[...]

  # BertAttention: dropout(attn_out) + x  then LayerNorm   (dropout == identity)
  y = _layernorm(attn_out + h, ln1g_ref[...], ln1b_ref[...])

  # BertIntermediate (exact GELU) + BertOutput (residual LayerNorm)
  inter = _gelu_exact(jnp.dot(y.astype(BF16), w1_ref[...],
                              preferred_element_type=F32) + b1_ref[...])
  ff = jnp.dot(inter.astype(BF16), w2_ref[...],
               preferred_element_type=F32) + b2_ref[...]
  z = _layernorm(ff + y, ln2g_ref[...], ln2b_ref[...])

  newres_ref[0] = z.astype(newres_ref.dtype)                          # bf16 residual
  acou_ref[0] = jnp.dot(z.astype(BF16), wac_ref[...],
                        preferred_element_type=F32) + bac_ref[...]    # lane-padded


# -------------------------------- wrappers ----------------------------------

def project_pos_emb_pallas(packed, pos_emb):
  """Layer-independent half of the positional projection (hoist across layers).

  Returns (Lp, hidden) bf16 where Lp = round_up(P + 1, 128); row 0 is the torch
  rel_shift zero-pad column, rows 1..P hold project_pos_emb(pos_emb)."""
  acoustic = packed["acoustic_hidden_size"]
  hidden = packed["hidden_size"]
  pos2d = pos_emb.reshape(-1, acoustic).astype(BF16)
  p_len = pos2d.shape[0]
  lp_pad = _round_up(p_len + 1, 128)
  pos_pad = jnp.pad(pos2d, ((1, lp_pad - p_len - 1), (0, 0)))
  return pl.pallas_call(
      _pos_proj_kernel,
      out_shape=jax.ShapeDtypeStruct((lp_pad, hidden), BF16),
  )(pos_pad, packed["w_pos_proj"], packed["b_pos_proj"])


def _const_spec(a, single_buffer):
  """BlockSpec for a grid-invariant operand (weights / biases / pos proj)."""
  nd = a.ndim
  idx = lambda b, _nd=nd: (0,) * _nd
  if single_buffer:
    # Never re-fetched across the batch grid: single-buffer to halve VMEM use.
    return pl.BlockSpec(a.shape, idx, pipeline_mode=pl.Buffered(1))
  return pl.BlockSpec(a.shape, idx)


def _encoder_layer_pallas(x, residual, p_all, plp, hidden, n_head, a_pad, use_roll):
  B, N, V = x.shape
  d_k = hidden // n_head
  lp_len = p_all.shape[0]

  inputs = (
      x, residual, p_all,
      plp["pos_bias_u"], plp["pos_bias_v"],
      plp["w_fuse_x"], plp["w_fuse_r"], plp["b_fuse"],
      plp["w_qkv"], plp["b_qkv"],
      plp["w_out"], plp["b_out"], plp["ln1_g"], plp["ln1_b"],
      plp["w_ffn1"], plp["b_ffn1"], plp["w_ffn2"], plp["b_ffn2"],
      plp["ln2_g"], plp["ln2_b"],
      plp["w_ac"], plp["b_ac"],
  )
  out_shape = (jax.ShapeDtypeStruct((B, N, a_pad), F32),
               jax.ShapeDtypeStruct((B, N, hidden), BF16))
  out_specs = (pl.BlockSpec((1, N, a_pad), lambda b: (b, 0, 0)),
               pl.BlockSpec((1, N, hidden), lambda b: (b, 0, 0)))
  kernel = functools.partial(_encoder_layer_kernel, n_head=n_head, d_k=d_k,
                             use_roll=use_roll)

  # Advisory cost estimate so XLA can schedule around the custom call.
  flops = 2 * B * N * (hidden * (V + hidden + 3 * hidden + hidden + 8 * hidden + a_pad)
                       + hidden * (2 * N + lp_len))
  transc = B * N * (n_head * N + 4 * hidden)
  w_bytes = sum(int(a.size) * a.dtype.itemsize for a in inputs[2:])
  io_bytes = (int(x.size) + int(residual.size)) * 2 + B * N * (a_pad * 4 + hidden * 2)
  ce = pl.CostEstimate(flops=int(flops), transcendentals=int(transc),
                       bytes_accessed=int(w_bytes + io_bytes))

  def call(single_buffer):
    in_specs = [pl.BlockSpec((1, N, V), lambda b: (b, 0, 0)),
                pl.BlockSpec((1, N, hidden), lambda b: (b, 0, 0))]
    in_specs += [_const_spec(a, single_buffer) for a in inputs[2:]]
    return pl.pallas_call(
        kernel,
        grid=(B,),
        in_specs=in_specs,
        out_specs=out_specs,
        out_shape=out_shape,
        scratch_shapes=[pltpu.VMEM((N, hidden), BF16)],
        compiler_params=pltpu.CompilerParams(
            dimension_semantics=("parallel",),
            vmem_limit_bytes=_vmem_limit_bytes()),
        cost_estimate=ce,
    )(*inputs)

  if _SINGLE_BUFFER_WEIGHTS[0]:
    try:
      return call(True)
    except Exception:
      _SINGLE_BUFFER_WEIGHTS[0] = False   # this Pallas rejects Buffered(1): fall back
  return call(False)


def bert_encoder_ctc_forward(packed, x, layer_num, pos_emb, residual=None,
                             attention_mask=None, pos_proj=None):
  """Mirrors BertEncoderCTC.forward; returns (acoustic_out, new_residual)."""
  # TODO(synk): attention_mask support (masked_fill path) not implemented.
  assert attention_mask is None
  B, N, V = x.shape
  hidden = packed["hidden_size"]
  n_head = packed["num_heads"]
  acoustic = packed["acoustic_hidden_size"]
  a_pad = packed["acoustic_pad"]
  assert 0 <= layer_num < len(packed["layers"])
  assert hidden % n_head == 0
  plp = packed["layers"][layer_num]

  p_len = pos_emb.reshape(-1, acoustic).shape[0]
  assert p_len >= 2 * N - 1, "rel_shift kernel assumes pos_len >= 2*N - 1"
  # NOTE: for full lane utilization production shapes want hidden % 128 == 0 and
  # acoustic padded (done); toy shapes fall back to full-array blocks, still valid.

  if residual is None:
    residual = jnp.broadcast_to(packed["initial_residual"], (B, N, hidden))
  residual = residual.astype(BF16)      # residual stream lives in bf16
  x = x.astype(BF16)

  if pos_proj is None:
    pos_proj = project_pos_emb_pallas(packed, pos_emb)
  lp_pad = pos_proj.shape[0]
  assert lp_pad >= 2 * N

  # per-layer bias-free linear_pos, kept lane-dense as (Lp, hidden) bf16
  p_all = pl.pallas_call(
      _linear_pos_kernel,
      out_shape=jax.ShapeDtypeStruct((lp_pad, hidden), BF16),
  )(pos_proj, plp["w_linear_pos"])

  use_roll = _strided_roll_rel_shift_ok(N, lp_pad)

  acou_pad, new_residual = _encoder_layer_pallas(
      x, residual, p_all, plp, hidden, n_head, a_pad, use_roll)
  return acou_pad[..., :acoustic], new_residual


# -------------------------- params: init & packing --------------------------

def init_params(key, num_layers, hidden, n_head, vocab, acoustic):
  cnt = [0]

  def w(shape, scale=0.02):
    cnt[0] += 1
    return scale * jax.random.normal(jax.random.fold_in(key, cnt[0]), shape, F32)

  params = dict(
      hidden_size=hidden, num_heads=n_head, ctc_vocab_size=vocab,
      acoustic_hidden_size=acoustic,
      # project_pos_emb: nn.Linear(acoustic, hidden), stored transposed (in,out)
      w_pos_proj=w((acoustic, hidden)), b_pos_proj=w((hidden,)),
      # nn.Parameter(torch.zeros(1, 1, hidden))
      initial_residual=jnp.zeros((1, 1, hidden), F32),
      layers=[],
  )
  for _ in range(num_layers):
    lp = dict(
        # fuse_input_layers[i]: nn.Linear(hidden + vocab, hidden); weight split
        # into the x part (first `vocab` inputs) and residual part, transposed.
        w_fuse_x=w((vocab, hidden)), w_fuse_r=w((hidden, hidden)),
        b_fuse=w((hidden,)),
        w_q=w((hidden, hidden)), b_q=w((hidden,)),
        w_k=w((hidden, hidden)), b_k=w((hidden,)),
        w_v=w((hidden, hidden)), b_v=w((hidden,)),
        w_linear_pos=w((hidden, hidden)),                 # bias-free
        pos_bias_u=w((n_head, hidden // n_head)),
        pos_bias_v=w((n_head, hidden // n_head)),
        w_out=w((hidden, hidden)), b_out=w((hidden,)),
        ln1_g=jnp.ones((hidden,), F32), ln1_b=jnp.zeros((hidden,), F32),
        w_ffn1=w((hidden, 4 * hidden)), b_ffn1=w((4 * hidden,)),
        w_ffn2=w((4 * hidden, hidden)), b_ffn2=w((hidden,)),
        ln2_g=jnp.ones((hidden,), F32), ln2_b=jnp.zeros((hidden,), F32),
        # project_to_acoustic_layers[i]: nn.Linear(hidden, acoustic)
        w_ac=w((hidden, acoustic)), b_ac=w((acoustic,)),
    )
    params["layers"].append(lp)
  return params


def pack_params(params):
  """One-time kernel-side packing: bf16 casts, fused QKV, lane-padded acoustic
  projection, 1/sqrt(d_k) folded into q-side weights/biases.  No per-call
  concat/pad/cast XLA ops remain in front of the pallas_call."""
  hidden = params["hidden_size"]
  n_head = params["num_heads"]
  acoustic = params["acoustic_hidden_size"]
  d_k = hidden // n_head
  inv = 1.0 / math.sqrt(d_k)
  a_pad = _round_up(acoustic, 128)

  packed = dict(
      hidden_size=hidden, num_heads=n_head,
      ctc_vocab_size=params["ctc_vocab_size"],
      acoustic_hidden_size=acoustic, acoustic_pad=a_pad,
      w_pos_proj=params["w_pos_proj"].astype(BF16),
      b_pos_proj=params["b_pos_proj"].reshape(1, hidden).astype(F32),
      initial_residual=params["initial_residual"].astype(BF16),
      layers=[],
  )
  for lp in params["layers"]:
    w_qkv = jnp.concatenate([lp["w_q"] * inv, lp["w_k"], lp["w_v"]],
                            axis=1).astype(BF16)
    b_qkv = jnp.concatenate([lp["b_q"] * inv, lp["b_k"], lp["b_v"]]
                            ).reshape(1, 3 * hidden).astype(F32)
    packed["layers"].append(dict(
        w_fuse_x=lp["w_fuse_x"].astype(BF16),
        w_fuse_r=lp["w_fuse_r"].astype(BF16),
        b_fuse=lp["b_fuse"].reshape(1, hidden).astype(F32),
        w_qkv=w_qkv, b_qkv=b_qkv,
        w_linear_pos=lp["w_linear_pos"].astype(BF16),
        pos_bias_u=(lp["pos_bias_u"].reshape(1, hidden) * inv).astype(F32),
        pos_bias_v=(lp["pos_bias_v"].reshape(1, hidden) * inv).astype(F32),
        w_out=lp["w_out"].astype(BF16),
        b_out=lp["b_out"].reshape(1, hidden).astype(F32),
        ln1_g=lp["ln1_g"].reshape(1, hidden).astype(F32),
        ln1_b=lp["ln1_b"].reshape(1, hidden).astype(F32),
        w_ffn1=lp["w_ffn1"].astype(BF16),
        b_ffn1=lp["b_ffn1"].reshape(1, 4 * hidden).astype(F32),
        w_ffn2=lp["w_ffn2"].astype(BF16),
        b_ffn2=lp["b_ffn2"].reshape(1, hidden).astype(F32),
        ln2_g=lp["ln2_g"].reshape(1, hidden).astype(F32),
        ln2_b=lp["ln2_b"].reshape(1, hidden).astype(F32),
        w_ac=jnp.pad(lp["w_ac"], ((0, 0), (0, a_pad - acoustic))).astype(BF16),
        b_ac=jnp.pad(lp["b_ac"], (0, a_pad - acoustic)).reshape(1, a_pad).astype(F32),
    ))
  return packed


# ------------------------- pure-JAX reference check -------------------------

def _rel_shift_ref(x):
  """Literal port of torch rel_shift: pad left, view, drop first row, view."""
  b, h, t, p = x.shape
  xp = jnp.pad(x, ((0, 0), (0, 0), (0, 0), (1, 0)))
  flat = xp.reshape(b, h, t * (p + 1))
  return flat[:, :, t:].reshape(b, h, t, p)


def _ref_forward(params, x, layer_num, pos_emb, residual=None,
                 matmul_dtype=jnp.float32):
  """Pure-JAX port of the PyTorch forward.  matmul_dtype=bf16 mirrors the
  kernels' MXU operand policy (bf16 inputs, f32 accumulation, 1/sqrt(dk) folded
  into the packed q-side weights)."""
  hp = lax.Precision.HIGHEST
  c = lambda a: a.astype(matmul_dtype)

  def dot(a, b):
    return jnp.matmul(c(a), c(b), precision=hp, preferred_element_type=F32)

  B, N, V = x.shape
  hidden = params["hidden_size"]
  H = params["num_heads"]
  dk = hidden // H
  acoustic = params["acoustic_hidden_size"]
  lp = params["layers"][layer_num]
  if residual is None:
    residual = jnp.broadcast_to(params["initial_residual"], (B, N, hidden))

  xr = jnp.concatenate([x, residual.astype(F32)], axis=-1)
  w_fuse = jnp.concatenate([lp["w_fuse_x"], lp["w_fuse_r"]], axis=0)
  h = dot(xr, w_fuse) + lp["b_fuse"]

  p1 = dot(pos_emb.reshape(-1, acoustic), params["w_pos_proj"]) + params["b_pos_proj"]
  p_proj = dot(p1, lp["w_linear_pos"])
  P = p_proj.shape[0]
  p = p_proj.reshape(P, H, dk).transpose(1, 0, 2)              # (H, P, dk)

  fold = (matmul_dtype == BF16)          # mirror the kernels' scale-folding policy
  inv = 1.0 / math.sqrt(dk)
  w_q = lp["w_q"] * inv if fold else lp["w_q"]
  b_q = lp["b_q"] * inv if fold else lp["b_q"]
  pbu = lp["pos_bias_u"] * inv if fold else lp["pos_bias_u"]
  pbv = lp["pos_bias_v"] * inv if fold else lp["pos_bias_v"]

  q = (dot(h, w_q) + b_q).reshape(B, N, H, dk)
  k = (dot(h, lp["w_k"]) + lp["b_k"]).reshape(B, N, H, dk)
  v = (dot(h, lp["w_v"]) + lp["b_v"]).reshape(B, N, H, dk)
  q_u = (q + pbu).transpose(0, 2, 1, 3)
  q_v = (q + pbv).transpose(0, 2, 1, 3)
  kt = k.transpose(0, 2, 1, 3)
  vt = v.transpose(0, 2, 1, 3)

  ac = jnp.einsum("bhnd,bhmd->bhnm", c(q_u), c(kt), precision=hp,
                  preferred_element_type=F32)
  bd = jnp.einsum("bhnd,hpd->bhnp", c(q_v), c(p), precision=hp,
                  preferred_element_type=F32)
  bd = _rel_shift_ref(bd)[:, :, :, :N]
  scores = (ac + bd) if fold else (ac + bd) / math.sqrt(dk)
  attn = jax.nn.softmax(scores, axis=-1)
  ctx = jnp.einsum("bhnm,bhmd->bhnd", c(attn), c(vt), precision=hp,
                   preferred_element_type=F32)
  ctx = ctx.transpose(0, 2, 1, 3).reshape(B, N, hidden)
  attn_out = dot(ctx, lp["w_out"]) + lp["b_out"]
  y = _layernorm(attn_out + h, lp["ln1_g"], lp["ln1_b"])
  inter = jax.nn.gelu(dot(y, lp["w_ffn1"]) + lp["b_ffn1"], approximate=False)
  ff = dot(inter, lp["w_ffn2"]) + lp["b_ffn2"]
  z = _layernorm(ff + y, lp["ln2_g"], lp["ln2_b"])
  return dot(z, lp["w_ac"]) + lp["b_ac"], z


# ----------------------------------- main ------------------------------------

if __name__ == "__main__":
  B, N = 2, 8                 # batch, sequence length
  hidden, n_head = 32, 4      # BERT hidden size, attention heads (d_k = 8)
  vocab, acoustic = 16, 24    # ctc_vocab_size, acoustic_hidden_size
  num_layers = 2
  P = 2 * N - 1               # relative positional encoding length

  key = jax.random.PRNGKey(0)
  params = init_params(key, num_layers, hidden, n_head, vocab, acoustic)
  packed = pack_params(params)            # one-time weight packing (bf16/concat/pad)
  kx, kp = jax.random.split(jax.random.fold_in(key, 12345))
  x = jax.random.normal(kx, (B, N, vocab), F32)          # CTC features
  pos_emb = jax.random.normal(kp, (1, P, acoustic), F32)

  # hoist the layer-independent half of the positional projection across layers
  pos_proj = project_pos_emb_pallas(packed, pos_emb)

  # layer 0 with the learned initial residual, layer 1 fed with new_residual.
  out0, res0 = bert_encoder_ctc_forward(packed, x, 0, pos_emb, pos_proj=pos_proj)
  out1, res1 = bert_encoder_ctc_forward(packed, x, 1, pos_emb, residual=res0,
                                        pos_proj=pos_proj)
  jax.block_until_ready((out0, res0, out1, res1))

  # Tight check against a reference matched to the kernels' bf16-operand MXU
  # policy (layer 1 checked in isolation on the kernel's layer-0 residual).
  ref_out0, ref_res0 = _ref_forward(params, x, 0, pos_emb, None, BF16)
  ref_out1, ref_res1 = _ref_forward(params, x, 1, pos_emb, res0, BF16)
  for got, ref in ((out0, ref_out0), (res0, ref_res0),
                   (out1, ref_out1), (res1, ref_res1)):
    np.testing.assert_allclose(np.asarray(got.astype(F32)),
                               np.asarray(ref.astype(F32)),
                               atol=3e-3, rtol=3e-3)

  # Loose end-to-end check against the full-f32 (PyTorch-faithful) reference;
  # the gap is the intentional bf16-operand relaxation of the kernels.
  f_out0, f_res0 = _ref_forward(params, x, 0, pos_emb, None, F32)
  f_out1, f_res1 = _ref_forward(params, x, 1, pos_emb, f_res0, F32)
  for got, ref in ((out0, f_out0), (res0, f_res0),
                   (out1, f_out1), (res1, f_res1)):
    np.testing.assert_allclose(np.asarray(got.astype(F32)),
                               np.asarray(ref.astype(F32)),
                               atol=5e-2, rtol=5e-2)

  print("KERNEL_OK")
</pallas_src>

<mosaic_0001>
module attributes {stable_mosaic.version = 11 : i64} {
  func.func @_pos_proj_kernel(%arg0: memref<128x24xbf16, #tpu.memory_space<vmem>>, %arg1: memref<24x32xbf16, #tpu.memory_space<vmem>>, %arg2: memref<1x32xf32, #tpu.memory_space<vmem>>, %arg3: memref<128x32xbf16, #tpu.memory_space<vmem>>) attributes {dimension_semantics = [], scalar_prefetch = 0 : i64, scratch_operands = 0 : i64, tpu.core_type = #tpu.core_type<tc>} {
    %c0 = arith.constant 0 : index
    %c0_0 = arith.constant 0 : index
    %0 = vector.load %arg0[%c0, %c0_0] : memref<128x24xbf16, #tpu.memory_space<vmem>>, vector<128x24xbf16>
    %c0_1 = arith.constant 0 : index
    %c0_2 = arith.constant 0 : index
    %1 = vector.load %arg1[%c0_1, %c0_2] : memref<24x32xbf16, #tpu.memory_space<vmem>>, vector<24x32xbf16>
    %cst = arith.constant dense<0.000000e+00> : vector<128x32xf32>
    %2 = tpu.matmul %0, %1, %cst {dimension_numbers = #tpu.dot_dimension_numbers<[1], [0], [0], [1], [0, 0, 1, 1], [], []>} : vector<128x24xbf16>, vector<24x32xbf16>, vector<128x32xf32> -> vector<128x32xf32>
    %c0_3 = arith.constant 0 : index
    %c0_4 = arith.constant 0 : index
    %3 = vector.load %arg2[%c0_3, %c0_4] : memref<1x32xf32, #tpu.memory_space<vmem>>, vector<1x32xf32>
    %4 = vector.broadcast %3 : vector<1x32xf32> to vector<128x32xf32>
    %5 = arith.addf %2, %4 : vector<128x32xf32>
    %6 = arith.truncf %5 : vector<128x32xf32> to vector<128x32xbf16>
    %c0_5 = arith.constant 0 : index
    %c0_6 = arith.constant 0 : index
    %7 = vector.load %arg3[%c0_5, %c0_6] : memref<128x32xbf16, #tpu.memory_space<vmem>>, vector<128x32xbf16>
    tpu.vector_store %arg3[%c0_5, %c0_6], %6 {strides = array<i32>} : memref<128x32xbf16, #tpu.memory_space<vmem>>, vector<128x32xbf16>,
    return
  }
}

</mosaic_0001>

<bundles_post_ra>
// kernel: tpu_custom_call.1
= control target key start
LH: loop header
LB: loop body
LE: loop exit
PB: predicated region body
PF: predicated region fallthrough
CT: control target
= control target key end

     0   :  { %vm115_vm0 = vcmask 1043456   ;;  %vm90_vm1 = vcmask 195584   ;;  %vm280_vm2 = vcmask 257024   ;;  %s523_s1 = inlined_call_operand.vmem [shape: bf16[24,32], index: 1, kind: input, shape index: {}]   ;;  %s524_s0 = inlined_call_operand.vmem [shape: bf16[128,24], index: 0, kind: input, shape index: {}]   ;;  %s525_s2 = inlined_call_operand.vmem [shape: f32[1,32], index: 2, kind: input, shape index: {}]   ;;  %s526_s3 = inlined_call_operand.vmem [shape: bf16[128,32], index: 3, kind: output, shape index: {}]  }
   0x1   :  { %v388_v0 = vld [vmem:[%s523_s1] sm:$0xff]   ;;  %v389_v1 = vld [vmem:[%s523_s1 + $0x8] ss:$0 sps:$4 sm:$0xff]   ;;  %v394_v7 = vld [vmem:[%s524_s0 + $0x10] sm:$0xff]  }
   0x2   :  { %362 = vmatprep.subr.bf16.mxu0 %v388_v0  ;;  %382 = vmatprep.subr.bf16.mxu1 %v388_v0  ;;  %v390_v2 = vld [vmem:[%s524_s0] sm:$0xff]   ;;  %v117_v4 = vsel %vm115_vm0, %v389_v1, 0  ;;  %v392_v5 = vld [vmem:[%s524_s0 + $0x8] sm:$0xff]   ;;  %v395_v8 = vld [vmem:[%s524_s0 + $0x30] sm:$0xff]  }
   0x3   :  { %363 = vmatpush3.bf16.msra.mxu0 %v388_v0  ;;  %384 = vmatpush3.bf16.msra.mxu1 %v388_v0  ;;  %v391_v3 = vld [vmem:[%s524_s0 + $0x20] sm:$0xff]   ;;  %v393_v6 = vld [vmem:[%s524_s0 + $0x28] sm:$0xff]   ;;  %v396_v9 = vld [vmem:[%s524_s0 + $0x18] sm:$0xff]  }
   0x4   :  { %386 = vmatprep.subr.msk.bf16.mxu0 %vm115_vm0, %v389_v1  ;;  %387 = vmatprep.subr.msk.bf16.mxu1 %vm115_vm0, %v389_v1  ;;  %v397_v10 = vld [vmem:[%s524_s0 + $0x38] sm:$0xff]   ;;  %v301_v11 = vld [vmem:[%s525_s2] ss:$0 sm:$0xff] }
   0x5   :  { %366 = vmatprep.mubr.msk.bf16.mxu0 %vm90_vm1, %v390_v2  ;;  %374 = vmatprep.mubr.msk.bf16.mxu1 %vm90_vm1, %v391_v3 }
   0x7   :  { %365 = vmatpush3.bf16.msra.mxu0 %v117_v4  ;;  %385 = vmatpush3.bf16.msra.mxu1 %v117_v4 }
   0xa   :  { %367 = vmatmul.mubr.msk.bf16.vlgmr.msra.gmra.mrb[0].mxu0 %vm90_vm1, %v392_v5  ;;  %375 = vmatmul.mubr.msk.bf16.vlgmr.msra.gmra.mrb[0].mxu1 %vm90_vm1, %v393_v6 }
   0xb   :  { %370 = vmatprep.mubr.msk.bf16.mxu0 %vm90_vm1, %v394_v7  ;;  %378 = vmatprep.mubr.msk.bf16.mxu1 %vm90_vm1, %v395_v8 }
  0x12   :  { %371 = vmatmul.mubr.msk.bf16.gmra.mrb[4].mxu0 %vm90_vm1, %v396_v9  ;;  %379 = vmatmul.mubr.msk.bf16.gmra.mrb[4].mxu1 %vm90_vm1, %v397_v10 }
  0xdd   :  { %v368_v12 = vpop.f32.mrb[0].mxu0  ;;  %v376_v13 = vpop.f32.mrb[0].mxu1 }
  0xde   :  { %v162_v14 = vadd.f32 %v368_v12, %v301_v11  ;;  %v194_v15 = vadd.f32 %v376_v13, %v301_v11  ;;  %v153_v16 = vpop.f32.mrb[1].mxu0  ;;  %v185_v17 = vpop.f32.mrb[1].mxu1 }
  0xdf   :  { %v154_v18 = vadd.f32 %v301_v11, %v153_v16  ;;  %v186_v19 = vadd.f32 %v301_v11, %v185_v17  ;;  %v369_v20 = vpop.f32.mrb[2].mxu0  ;;  %v377_v21 = vpop.f32.mrb[2].mxu1 }
  0xe0   :  { %v338_v22 = vpack.c.bf16 %v162_v14, %v162_v14  ;;  %v346_v23 = vpack.c.bf16 %v194_v15, %v194_v15  ;;  %v165_v24 = vadd.f32 %v369_v20, %v301_v11  ;;  %v197_v25 = vadd.f32 %v377_v21, %v301_v11  ;;  %v156_v26 = vpop.f32.mrb[3].mxu0  ;;  %v188_v27 = vpop.f32.mrb[3].mxu1 }
  0xe1   :  { %v336_v28 = vpack.c.bf16 %v154_v18, %v154_v18  ;;  %v344_v29 = vpack.c.bf16 %v186_v19, %v186_v19  ;;  %v157_v30 = vadd.f32 %v301_v11, %v156_v26  ;;  %v189_v31 = vadd.f32 %v301_v11, %v188_v27 }
  0xe2   :  { %283 = vst.msk [vmem:[%s526_s3 + $0x8] sm:$0xf] %vm280_vm2, %v338_v22  ;;  %291 = vst.msk [vmem:[%s526_s3 + $0x28] sm:$0xf] %vm280_vm2, %v346_v23  ;;  %v339_v32 = vpack.c.bf16 %v165_v24, %v165_v24  ;;  %v347_v33 = vpack.c.bf16 %v197_v25, %v197_v25 }
  0xe3   :  { %281 = vst.msk [vmem:[%s526_s3] sm:$0xf] %vm280_vm2, %v336_v28  ;;  %289 = vst.msk [vmem:[%s526_s3 + $0x20] sm:$0xf] %vm280_vm2, %v344_v29  ;;  %v337_v34 = vpack.c.bf16 %v157_v30, %v157_v30  ;;  %v345_v35 = vpack.c.bf16 %v189_v31, %v189_v31 }
  0xe4   :  { %284 = vst.msk [vmem:[%s526_s3 + $0xc] sm:$0xf] %vm280_vm2, %v339_v32  ;;  %292 = vst.msk [vmem:[%s526_s3 + $0x2c] sm:$0xf] %vm280_vm2, %v347_v33 }
  0xe5   :  { %282 = vst.msk [vmem:[%s526_s3 + $0x4] sm:$0xf] %vm280_vm2, %v337_v34  ;;  %290 = vst.msk [vmem:[%s526_s3 + $0x24] sm:$0xf] %vm280_vm2, %v345_v35  ;;  %v372_v36 = vpop.f32.mrb[4].mxu0  ;;  %v380_v37 = vpop.f32.mrb[4].mxu1 }
  0xe6   :  { %v178_v38 = vadd.f32 %v372_v36, %v301_v11  ;;  %v210_v39 = vadd.f32 %v380_v37, %v301_v11  ;;  %v169_v40 = vpop.f32.mrb[5].mxu0  ;;  %v201_v41 = vpop.f32.mrb[5].mxu1 }
  0xe7   :  { %v170_v42 = vadd.f32 %v301_v11, %v169_v40  ;;  %v202_v43 = vadd.f32 %v301_v11, %v201_v41  ;;  %v373_v44 = vpop.f32.mrb[6].mxu0  ;;  %v381_v45 = vpop.f32.mrb[6].mxu1 }
  0xe8   :  { %v342_v46 = vpack.c.bf16 %v178_v38, %v178_v38  ;;  %v350_v47 = vpack.c.bf16 %v210_v39, %v210_v39  ;;  %v181_v48 = vadd.f32 %v373_v44, %v301_v11  ;;  %v213_v49 = vadd.f32 %v381_v45, %v301_v11  ;;  %v172_v50 = vpop.f32.mrb[7].mxu0  ;;  %v204_v51 = vpop.f32.mrb[7].mxu1 }
  0xe9   :  { %v340_v52 = vpack.c.bf16 %v170_v42, %v170_v42  ;;  %v348_v53 = vpack.c.bf16 %v202_v43, %v202_v43  ;;  %v173_v54 = vadd.f32 %v301_v11, %v172_v50  ;;  %v205_v55 = vadd.f32 %v301_v11, %v204_v51 }
  0xea   :  { %287 = vst.msk [vmem:[%s526_s3 + $0x18] sm:$0xf] %vm280_vm2, %v342_v46  ;;  %295 = vst.msk [vmem:[%s526_s3 + $0x38] sm:$0xf] %vm280_vm2, %v350_v47  ;;  %v343_v56 = vpack.c.bf16 %v181_v48, %v181_v48  ;;  %v351_v57 = vpack.c.bf16 %v213_v49, %v213_v49 }
  0xeb   :  { %285 = vst.msk [vmem:[%s526_s3 + $0x10] sm:$0xf] %vm280_vm2, %v340_v52  ;;  %293 = vst.msk [vmem:[%s526_s3 + $0x30] sm:$0xf] %vm280_vm2, %v348_v53  ;;  %v341_v58 = vpack.c.bf16 %v173_v54, %v173_v54  ;;  %v349_v59 = vpack.c.bf16 %v205_v55, %v205_v55 }
  0xec   :  { %288 = vst.msk [vmem:[%s526_s3 + $0x1c] sm:$0xf] %vm280_vm2, %v343_v56  ;;  %296 = vst.msk [vmem:[%s526_s3 + $0x3c] sm:$0xf] %vm280_vm2, %v351_v57 }
  0xed   :  { %286 = vst.msk [vmem:[%s526_s3 + $0x14] sm:$0xf] %vm280_vm2, %v341_v58  ;;  %294 = vst.msk [vmem:[%s526_s3 + $0x34] sm:$0xf] %vm280_vm2, %v349_v59 }

</bundles_post_ra>
